<compile_context>
chip_gen: v5e
topology: v5e:2x2
jax: 0.10.0
libtpu: 0.0.40
codegen_flags: <defaults>
</compile_context>

<pallas_src>
import jax
import jax.numpy as jnp
from jax.experimental import pallas as pl
from jax.experimental.pallas import tpu as pltpu


def _round_up(v: int, m: int) -> int:
    return ((v + m - 1) // m) * m


# ----------------------------- kernels ------------------------------------ #

def _linear_kernel_single_k(x_ref, w_ref, b_ref, o_ref):
    # x_ref: (TM, TK), w_ref: (TK, TN), b_ref: (1, TN), o_ref: (TM, TN)
    acc = jnp.dot(x_ref[...], w_ref[...], preferred_element_type=jnp.float32)
    o_ref[...] = (acc + b_ref[...]).astype(o_ref.dtype)


def _linear_kernel_multi_k(x_ref, w_ref, b_ref, o_ref, acc_ref):
    # Reduction axis (k) is the last / fastest grid axis.
    k = pl.program_id(2)

    @pl.when(k == 0)
    def _():
        acc_ref[...] = jnp.zeros_like(acc_ref)

    acc_ref[...] += jnp.dot(x_ref[...], w_ref[...],
                            preferred_element_type=jnp.float32)

    @pl.when(k == pl.num_programs(2) - 1)
    def _():
        o_ref[...] = (acc_ref[...] + b_ref[...]).astype(o_ref.dtype)


# ----------------------------- wrapper ------------------------------------ #

def make_classifier_head(weight, bias, *, param_dtype=None,
                         out_dtype=jnp.float32,
                         tm_cap=1024, tn_cap=512, tk_cap=1024):
    """Build a jitted forward for y = x @ weight.T + bias.

    weight: (C, D) float32 (PyTorch nn.Linear layout), bias: (C,).
    All weight-side prep (transpose, pad, cast) is done once here.
    """
    C, D = weight.shape
    assert bias.shape == (C,)

    bf16 = (param_dtype == jnp.bfloat16) or (out_dtype == jnp.bfloat16)
    sub = 16 if bf16 else 8                       # sublane packing for batch tile

    TN = min(tn_cap, _round_up(C, 128))           # lane-dense class tile
    TK = min(tk_cap, _round_up(D, 128))           # reduction tile
    C_pad = _round_up(C, TN)
    D_pad = _round_up(D, TK)

    # ---- one-time parameter prep (stays in HBM across all forward calls) ----
    w_dtype = param_dtype if param_dtype is not None else weight.dtype
    w_t = jnp.zeros((D_pad, C_pad), dtype=w_dtype)
    w_t = w_t.at[:D, :C].set(weight.T.astype(w_dtype))         # (D, C) layout
    b_p = jnp.zeros((1, C_pad), dtype=jnp.float32)
    b_p = b_p.at[0, :C].set(bias.astype(jnp.float32))

    x_dtype = param_dtype if param_dtype is not None else weight.dtype
    itm_x = jnp.dtype(x_dtype).itemsize
    itm_w = jnp.dtype(w_dtype).itemsize
    itm_o = jnp.dtype(out_dtype).itemsize

    @jax.jit
    def forward(x):
        B, D_in = x.shape
        assert D_in == D, "input feature dim mismatch"

        TM = min(tm_cap, _round_up(B, sub))
        B_pad = _round_up(B, TM)

        # Per-call x prep only (x is small relative to W).
        x_p = x.astype(x_dtype)
        if B_pad != B or D_pad != D:
            x_p = jnp.pad(x_p, ((0, B_pad - B), (0, D_pad - D)))

        grid_m = B_pad // TM
        grid_n = C_pad // TN
        grid_k = D_pad // TK

        # VMEM budget: double-buffered tiles + f32 accumulator + bias.
        vmem_bytes = (2 * (TM * TK * itm_x + TK * TN * itm_w + TM * TN * itm_o)
                      + TM * TN * 4 + 2 * TN * 4)
        vmem_limit = int(min(max(2 * vmem_bytes, 16 << 20), 60 << 20))

        cost = pl.CostEstimate(
            flops=2 * B_pad * C_pad * D_pad,
            transcendentals=0,
            bytes_accessed=(B_pad * D_pad * itm_x * grid_n     # x re-read per class tile
                            + D_pad * C_pad * itm_w * grid_m   # W re-read per batch tile
                            + B_pad * C_pad * itm_o),
        )

        out_shape = jax.ShapeDtypeStruct((B_pad, C_pad), out_dtype)

        if grid_k == 1:
            # Fast path: whole reduction in one tile -> no scratch, no pl.when.
            out = pl.pallas_call(
                _linear_kernel_single_k,
                out_shape=out_shape,
                grid=(grid_m, grid_n),
                in_specs=[
                    pl.BlockSpec((TM, TK), lambda i, j: (i, 0)),   # x
                    pl.BlockSpec((TK, TN), lambda i, j: (0, j)),   # W^T (D, C)
                    pl.BlockSpec((1, TN), lambda i, j: (0, j)),    # bias
                ],
                out_specs=pl.BlockSpec((TM, TN), lambda i, j: (i, j)),
                compiler_params=pltpu.CompilerParams(
                    dimension_semantics=("parallel", "parallel"),
                    vmem_limit_bytes=vmem_limit),
                cost_estimate=cost,
            )(x_p, w_t, b_p)
        else:
            # Large-D path: accumulate over k tiles in an f32 VMEM scratch.
            out = pl.pallas_call(
                _linear_kernel_multi_k,
                out_shape=out_shape,
                grid=(grid_m, grid_n, grid_k),
                in_specs=[
                    pl.BlockSpec((TM, TK), lambda i, j, k: (i, k)),
                    pl.BlockSpec((TK, TN), lambda i, j, k: (k, j)),
                    pl.BlockSpec((1, TN), lambda i, j, k: (0, j)),
                ],
                out_specs=pl.BlockSpec((TM, TN), lambda i, j, k: (i, j)),
                scratch_shapes=[pltpu.VMEM((TM, TN), jnp.float32)],
                compiler_params=pltpu.CompilerParams(
                    dimension_semantics=("parallel", "parallel", "arbitrary"),
                    vmem_limit_bytes=vmem_limit),
                cost_estimate=cost,
            )(x_p, w_t, b_p)

        if B_pad != B or C_pad != C:
            out = out[:B, :C]
        return out

    return forward


# ------------------------------- test -------------------------------------- #

if __name__ == "__main__":
    batch = 2
    input_dim = 32
    num_classes = 2

    key = jax.random.PRNGKey(0)
    kx, kw, kb = jax.random.split(key, 3)

    x = jax.random.normal(kx, (batch, input_dim), dtype=jnp.float32)
    bound = 1.0 / (input_dim ** 0.5)
    weight = jax.random.uniform(kw, (num_classes, input_dim),
                                minval=-bound, maxval=bound, dtype=jnp.float32)
    bias = jax.random.uniform(kb, (num_classes,),
                              minval=-bound, maxval=bound, dtype=jnp.float32)

    ref = x @ weight.T + bias

    # f32 path (exact).
    head = make_classifier_head(weight, bias)
    out = jax.block_until_ready(head(x))
    assert out.shape == (batch, num_classes)
    assert jnp.allclose(out, ref, atol=1e-5, rtol=1e-5)

    # bf16 params/compute path (weight pre-cast in HBM once; looser tolerance).
    head_bf16 = make_classifier_head(weight, bias, param_dtype=jnp.bfloat16)
    out_bf16 = jax.block_until_ready(head_bf16(x))
    assert jnp.allclose(out_bf16, ref, atol=5e-2, rtol=5e-2)

    # Exercise the multi-k accumulator path with a small tk_cap and larger D.
    d2 = 256
    kx2, kw2, kb2 = jax.random.split(jax.random.PRNGKey(1), 3)
    x2 = jax.random.normal(kx2, (batch, d2), dtype=jnp.float32)
    w2 = jax.random.uniform(kw2, (num_classes, d2), minval=-0.1, maxval=0.1,
                            dtype=jnp.float32)
    b2 = jax.random.uniform(kb2, (num_classes,), minval=-0.1, maxval=0.1,
                            dtype=jnp.float32)
    head2 = make_classifier_head(w2, b2, tk_cap=128)
    out2 = jax.block_until_ready(head2(x2))
    assert jnp.allclose(out2, x2 @ w2.T + b2, atol=1e-4, rtol=1e-4)

    print("KERNEL_OK")
</pallas_src>

<mosaic_0001>
module attributes {stable_mosaic.version = 11 : i64} {
  func.func @_linear_kernel_single_k(%arg0: i32, %arg1: i32, %arg2: memref<8x128xf32, #tpu.memory_space<vmem>>, %arg3: memref<128x128xf32, #tpu.memory_space<vmem>>, %arg4: memref<1x128xf32, #tpu.memory_space<vmem>>, %arg5: memref<8x128xf32, #tpu.memory_space<vmem>>) attributes {dimension_semantics = [#tpu.dimension_semantics<parallel>, #tpu.dimension_semantics<parallel>], iteration_bounds = array<i64: 1, 1>, scalar_prefetch = 0 : i64, scratch_operands = 0 : i64, tpu.core_type = #tpu.core_type<tc>, window_params = [{transform_indices = @transform_0, window_bounds = array<i64: 8, 128>}, {transform_indices = @transform_1, window_bounds = array<i64: 128, 128>}, {transform_indices = @transform_2, window_bounds = array<i64: 1, 128>}, {transform_indices = @transform_3, window_bounds = array<i64: 8, 128>}]} {
    %c0 = arith.constant 0 : index
    %c0_0 = arith.constant 0 : index
    %0 = vector.load %arg2[%c0, %c0_0] : memref<8x128xf32, #tpu.memory_space<vmem>>, vector<8x128xf32>
    %c0_1 = arith.constant 0 : index
    %c0_2 = arith.constant 0 : index
    %1 = vector.load %arg3[%c0_1, %c0_2] : memref<128x128xf32, #tpu.memory_space<vmem>>, vector<128x128xf32>
    %cst = arith.constant dense<0.000000e+00> : vector<8x128xf32>
    %2 = tpu.matmul %0, %1, %cst {dimension_numbers = #tpu.dot_dimension_numbers<[1], [0], [0], [1], [0, 0, 1, 1], [], []>} : vector<8x128xf32>, vector<128x128xf32>, vector<8x128xf32> -> vector<8x128xf32>
    %c0_3 = arith.constant 0 : index
    %c0_4 = arith.constant 0 : index
    %3 = vector.load %arg4[%c0_3, %c0_4] : memref<1x128xf32, #tpu.memory_space<vmem>>, vector<1x128xf32>
    %4 = vector.broadcast %3 : vector<1x128xf32> to vector<8x128xf32>
    %5 = arith.addf %2, %4 : vector<8x128xf32>
    %c0_5 = arith.constant 0 : index
    %c0_6 = arith.constant 0 : index
    %6 = vector.load %arg5[%c0_5, %c0_6] : memref<8x128xf32, #tpu.memory_space<vmem>>, vector<8x128xf32>
    tpu.vector_store %arg5[%c0_5, %c0_6], %5 {strides = array<i32>} : memref<8x128xf32, #tpu.memory_space<vmem>>, vector<8x128xf32>,
    return
  }
  func.func @transform_0(%arg0: i32, %arg1: i32) -> (i32, i32) {
    %c0_i32 = arith.constant 0 : i32
    %c0_i32_0 = arith.constant 0 : i32
    return %arg0, %c0_i32 : i32, i32
  }
  func.func @transform_1(%arg0: i32, %arg1: i32) -> (i32, i32) {
    %c0_i32 = arith.constant 0 : i32
    %c0_i32_0 = arith.constant 0 : i32
    return %c0_i32, %arg1 : i32, i32
  }
  func.func @transform_2(%arg0: i32, %arg1: i32) -> (i32, i32) {
    %c0_i32 = arith.constant 0 : i32
    %c0_i32_0 = arith.constant 0 : i32
    return %c0_i32, %arg1 : i32, i32
  }
  func.func @transform_3(%arg0: i32, %arg1: i32) -> (i32, i32) {
    %c0_i32 = arith.constant 0 : i32
    return %arg0, %arg1 : i32, i32
  }
}

</mosaic_0001>

<bundles_post_ra>
// kernel: forward.1
= control target key start
LH: loop header
LB: loop body
LE: loop exit
PB: predicated region body
PF: predicated region fallthrough
CT: control target
= control target key end

     0   :  { %8 = vsyncpa [#allocation3], 0  ;;  %s107_s15 = smov [#allocation2]   ;;  %s108_s17 = smov 128   ;;  %s142_s0 = inlined_call_operand.vmem [shape: f32[8,128], index: 0, kind: input, shape index: {}]   ;;  %s143_s1 = inlined_call_operand.hbm [shape: f32[128,128], index: 1, kind: input, shape index: {}]   ;;  %s144_s2 = inlined_call_operand.vmem [shape: f32[1,128], index: 2, kind: input, shape index: {}]   ;;  %s145_s3 = inlined_call_operand.vmem [shape: f32[8,128], index: 3, kind: output, shape index: {}]  }
   0x1   :  { %s15_s14 = sshll.u32 %s143_s1, 4  ;;  %s17_s16 = sshll.u32 %s107_s15, 4  ;;  %s16_s14 = int_to_ptr.hbm [resolvable:$true] %s15_s14  ;;  %s18_s16 = int_to_ptr.vmem [resolvable:$true] %s17_s16 }
   0x2   :  { %s109_s18 = smov 8  }
   0x3   :  { %23 = dma.hbm_to_vmem [thread:$0]  %s16_s14, 2048, %s18_s16, [#allocation3], %s108_s17, %s108_s17, %s109_s18  }
   0x4   :  { %105 = dma.done.wait [#allocation3], 2048  }
   0x5   :  { %106 = vsyncadd [#allocation3], 4294965248  ;;  %v46_v0 = vld [vmem:[#allocation2 + $0x78] sm:$0xff]  ;;  %v45_v1 = vld [vmem:[#allocation2 + $0x70] sm:$0xff] }
   0x6   :  { %51 = vmatpush.msra.mxu0 %v46_v0  ;;  %v44_v2 = vld [vmem:[#allocation2 + $0x68] sm:$0xff]  ;;  %v43_v3 = vld [vmem:[#allocation2 + $0x60] sm:$0xff]  ;;  %v42_v4 = vld [vmem:[#allocation2 + $0x58] sm:$0xff] }
   0x7   :  { %v41_v5 = vld [vmem:[#allocation2 + $0x50] sm:$0xff]  ;;  %v40_v6 = vld [vmem:[#allocation2 + $0x48] sm:$0xff]  ;;  %v39_v7 = vld [vmem:[#allocation2 + $0x40] sm:$0xff] }
   0x8   :  { %52 = vmatpush.msra.mxu0 %v45_v1  ;;  %v38_v8 = vld [vmem:[#allocation2 + $0x38] sm:$0xff]  ;;  %v37_v9 = vld [vmem:[#allocation2 + $0x30] sm:$0xff]  ;;  %v36_v10 = vld [vmem:[#allocation2 + $0x28] sm:$0xff] }
   0x9   :  { %v35_v11 = vld [vmem:[#allocation2 + $0x20] sm:$0xff]  ;;  %v34_v12 = vld [vmem:[#allocation2 + $0x18] sm:$0xff]  ;;  %v33_v13 = vld [vmem:[#allocation2 + $0x10] sm:$0xff] }
   0xa   :  { %53 = vmatpush.msra.mxu0 %v44_v2  ;;  %v32_v14 = vld [vmem:[#allocation2 + $0x8] sm:$0xff]  ;;  %v31_v15 = vld [vmem:[#allocation2] sm:$0xff] }
   0xb   :  { %v30_v16 = vld [vmem:[%s142_s0] sm:$0xff] }
   0xc   :  { %54 = vmatpush.msra.mxu0 %v43_v3  ;;  %v80_v17 = vld [vmem:[%s144_s2] ss:$0 sm:$0xff] }
   0xe   :  { %55 = vmatpush.msra.mxu0 %v42_v4 }
  0x10   :  { %56 = vmatpush.msra.mxu0 %v41_v5 }
  0x12   :  { %57 = vmatpush.msra.mxu0 %v40_v6 }
  0x14   :  { %58 = vmatpush.msra.mxu0 %v39_v7 }
  0x16   :  { %59 = vmatpush.msra.mxu0 %v38_v8 }
  0x18   :  { %60 = vmatpush.msra.mxu0 %v37_v9 }
  0x1a   :  { %61 = vmatpush.msra.mxu0 %v36_v10 }
  0x1c   :  { %62 = vmatpush.msra.mxu0 %v35_v11 }
  0x1e   :  { %63 = vmatpush.msra.mxu0 %v34_v12 }
  0x20   :  { %64 = vmatpush.msra.mxu0 %v33_v13 }
  0x22   :  { %65 = vmatpush.msra.mxu0 %v32_v14 }
  0x24   :  { %66 = vmatpush.msra.mxu0 %v31_v15 }
  0x25   :  { %67 = vmatmul.f32.vlgmr.msra.gmra.mxu0 %v30_v16 }
  0xa2   :  { %v68_v18 = vpop.f32.mrf.mxu0 }
  0xa3   :  { %v69_v19 = vadd.f32 %v80_v17, %v68_v18 }
  0xa5   :  { %71 = vst [vmem:[%s145_s3] sm:$0xff] %v69_v19 }
  0xa6   :  { %76 = vsyncpa [#allocation3], 1 }

</bundles_post_ra>
